<compile_context>
chip_gen: v5e
topology: v5e:2x2
jax: 0.10.0
libtpu: 0.0.40
codegen_flags: <defaults>
</compile_context>

<pallas_src>
import math
import jax
import jax.numpy as jnp
from jax.experimental import pallas as pl
from jax.experimental.pallas import tpu as pltpu


def _round_up(x: int, m: int) -> int:
    return (x + m - 1) // m * m


# --------------------------------------------------------------------------
# Stage 1: Q/K/V projection (run once; scale folded into Q).
# --------------------------------------------------------------------------
def _make_proj_kernel(scale: float):
    def kernel(e_ref, wq_ref, bq_ref, wk_ref, bk_ref, wv_ref, bv_ref,
               q_ref, k_ref, v_ref):
        e = e_ref[...].astype(jnp.bfloat16)          # cast in-kernel, E read once
        q = jnp.dot(e, wq_ref[...], preferred_element_type=jnp.float32) + bq_ref[...]
        q_ref[...] = (q * scale).astype(jnp.bfloat16)  # 1/sqrt(d_k) folded into Q
        k = jnp.dot(e, wk_ref[...], preferred_element_type=jnp.float32) + bk_ref[...]
        k_ref[...] = k.astype(jnp.bfloat16)
        v = jnp.dot(e, wv_ref[...], preferred_element_type=jnp.float32) + bv_ref[...]
        v_ref[...] = v.astype(jnp.bfloat16)
    return kernel


# --------------------------------------------------------------------------
# Stage 2: flash-style attention over pre-projected Q/K/V.
# --------------------------------------------------------------------------
def _make_attn_kernel(seq_len: int, tk: int, has_seq_padding: bool):
    def kernel(q_ref, k_ref, v_ref, out_ref, m_sc, l_sc, acc_sc):
        ki = pl.program_id(2)

        @pl.when(ki == 0)
        def _init():
            m_sc[...] = jnp.full_like(m_sc, -jnp.inf)
            l_sc[...] = jnp.zeros_like(l_sc)
            acc_sc[...] = jnp.zeros_like(acc_sc)

        # Scores without materializing K^T: contract d_k with d_k directly.
        s = jax.lax.dot_general(q_ref[...], k_ref[...], (((1,), (1,)), ((), ())),
                                preferred_element_type=jnp.float32)   # (tq, tk)

        if has_seq_padding:
            # -1e30 (not -inf) is safe: the first key tile always contains at
            # least one valid key, so m stays finite and exp(masked - m) == 0.
            key_pos = ki * tk + jax.lax.broadcasted_iota(jnp.int32, s.shape, 1)
            s = jnp.where(key_pos < seq_len, s, -1e30)

        # Online (flash-style) softmax update, f32 throughout (v5e EUP has no
        # bf16 path, and f32 exp keeps the looser-tolerance error budget small).
        m_prev = m_sc[...]
        m_new = jnp.maximum(m_prev, jnp.max(s, axis=-1, keepdims=True))
        alpha = jnp.exp(m_prev - m_new)
        p = jnp.exp(s - m_new)
        l_sc[...] = alpha * l_sc[...] + jnp.sum(p, axis=-1, keepdims=True)
        acc_sc[...] = alpha * acc_sc[...] + jnp.dot(
            p.astype(jnp.bfloat16), v_ref[...], preferred_element_type=jnp.float32)
        m_sc[...] = m_new

        @pl.when(ki == pl.num_programs(2) - 1)
        def _finalize():
            inv_l = pl.reciprocal(l_sc[...], approx=True)   # EUP, not VALU divide
            out_ref[...] = (acc_sc[...] * inv_l).astype(out_ref.dtype)
    return kernel


# --------------------------------------------------------------------------
# Wrapper.
# --------------------------------------------------------------------------
def self_att_head_level1(E, wq, bq, wk, bk, wv, bv, d_k: int):
    """E: (B, S, emb_dim). wq/wk: (d_k, emb_dim); wv: (emb_dim, emb_dim);
    biases 1-D. Returns (B, S, d_k) float32."""
    B, S, emb_dim = E.shape
    scale = 1.0 / math.sqrt(d_k)

    # Lane-dense output / head dimension.
    dkp = _round_up(d_k, 128)

    # --- sequence tiling ----------------------------------------------------
    MAX_TQ = 512
    # bf16 native sublane packing is 16 -> round small-S tiles to 16 rows.
    tq = _round_up(S, 16) if S <= MAX_TQ else MAX_TQ
    S_pad = _round_up(S, tq)
    n_q = S_pad // tq
    # Resident projected K/V per batch (single key tile, no re-streaming per
    # q-tile) when the bf16 K/V buffers and the (tq, tk) f32 score intermediate
    # stay small; stream 256-wide key tiles for longer sequences.
    tk = S_pad if S_pad <= 1024 else 256
    n_k = S_pad // tk
    has_seq_padding = S_pad != S

    # --- operand prep (E read exactly once, by the projection kernel) -------
    E_in = jnp.pad(E, ((0, 0), (0, S_pad - S), (0, 0))) if has_seq_padding else E

    def pad_w(w_t):    # (emb_dim, d) -> (emb_dim, dkp) bf16, zero-padded
        return jnp.zeros((emb_dim, dkp), jnp.bfloat16).at[:, :w_t.shape[1]].set(
            w_t.astype(jnp.bfloat16))

    def pad_b(b):      # (d,) -> (1, dkp) f32, zero-padded
        return jnp.zeros((1, dkp), jnp.float32).at[0, :b.shape[0]].set(
            b.astype(jnp.float32))

    wq_t = pad_w(wq.T)             # (emb_dim, dkp)
    wk_t = pad_w(wk.T)
    # Only the first d_k output features of V are ever used -> slice WV / bV.
    wv_t = pad_w(wv[:d_k, :].T)    # (emb_dim, dkp) instead of (emb_dim, emb_dim)
    bq_r, bk_r, bv_r = pad_b(bq), pad_b(bk), pad_b(bv[:d_k])

    vmem_limit = 32 * 1024 * 1024   # safe fraction of v7x's 64 MiB physical VMEM
    e_bytes = E.dtype.itemsize

    # --- stage 1: projection (Q scaled, K, V) -------------------------------
    q_proj, k_proj, v_proj = pl.pallas_call(
        _make_proj_kernel(scale),
        out_shape=(
            jax.ShapeDtypeStruct((B, S_pad, dkp), jnp.bfloat16),
            jax.ShapeDtypeStruct((B, S_pad, dkp), jnp.bfloat16),
            jax.ShapeDtypeStruct((B, S_pad, dkp), jnp.bfloat16),
        ),
        grid_spec=pltpu.PrefetchScalarGridSpec(
            num_scalar_prefetch=0,
            grid=(B, n_q),
            in_specs=[
                pl.BlockSpec((pl.Squeezed(), tq, emb_dim),
                             lambda b, si: (b, si, 0)),
                # Weights / biases: constant index_map -> resident across grid.
                pl.BlockSpec((emb_dim, dkp), lambda b, si: (0, 0)),   # WQ^T
                pl.BlockSpec((1, dkp), lambda b, si: (0, 0)),         # bQ
                pl.BlockSpec((emb_dim, dkp), lambda b, si: (0, 0)),   # WK^T
                pl.BlockSpec((1, dkp), lambda b, si: (0, 0)),         # bK
                pl.BlockSpec((emb_dim, dkp), lambda b, si: (0, 0)),   # WV^T[:, :d_k]
                pl.BlockSpec((1, dkp), lambda b, si: (0, 0)),         # bV[:d_k]
            ],
            out_specs=[
                pl.BlockSpec((pl.Squeezed(), tq, dkp), lambda b, si: (b, si, 0)),
                pl.BlockSpec((pl.Squeezed(), tq, dkp), lambda b, si: (b, si, 0)),
                pl.BlockSpec((pl.Squeezed(), tq, dkp), lambda b, si: (b, si, 0)),
            ],
        ),
        compiler_params=pltpu.CompilerParams(
            dimension_semantics=("parallel", "parallel"),
            vmem_limit_bytes=vmem_limit,
        ),
        cost_estimate=pl.CostEstimate(
            flops=int(6 * B * S_pad * emb_dim * dkp),
            transcendentals=0,
            bytes_accessed=int(B * S_pad * emb_dim * e_bytes
                               + 3 * emb_dim * dkp * 2 + 3 * dkp * 4
                               + 3 * B * S_pad * dkp * 2),
        ),
    )(E_in, wq_t, bq_r, wk_t, bk_r, wv_t, bv_r)

    # --- stage 2: flash attention over pre-projected Q/K/V ------------------
    kv_restream_factor = 1 if n_k == 1 else n_q   # K/V re-streamed per q-tile only when streaming
    attn_out = pl.pallas_call(
        _make_attn_kernel(S, tk, has_seq_padding),
        out_shape=jax.ShapeDtypeStruct((B, S_pad, dkp), jnp.float32),
        grid_spec=pltpu.PrefetchScalarGridSpec(
            num_scalar_prefetch=0,
            grid=(B, n_q, n_k),
            in_specs=[
                pl.BlockSpec((pl.Squeezed(), tq, dkp),
                             lambda b, qi, ki: (b, qi, 0)),
                pl.BlockSpec((pl.Squeezed(), tk, dkp),
                             lambda b, qi, ki: (b, ki, 0)),
                pl.BlockSpec((pl.Squeezed(), tk, dkp),
                             lambda b, qi, ki: (b, ki, 0)),
            ],
            out_specs=pl.BlockSpec((pl.Squeezed(), tq, dkp),
                                   lambda b, qi, ki: (b, qi, 0)),
            scratch_shapes=[
                pltpu.VMEM((tq, 1), jnp.float32),      # running max
                pltpu.VMEM((tq, 1), jnp.float32),      # running sum
                pltpu.VMEM((tq, dkp), jnp.float32),    # output accumulator
            ],
        ),
        compiler_params=pltpu.CompilerParams(
            dimension_semantics=("parallel", "parallel", "arbitrary"),
            vmem_limit_bytes=vmem_limit,
        ),
        cost_estimate=pl.CostEstimate(
            flops=int(4 * B * S_pad * S_pad * dkp),
            transcendentals=int(B * S_pad * S_pad),
            bytes_accessed=int(B * S_pad * dkp * 2                        # Q
                               + 2 * B * kv_restream_factor * S_pad * dkp * 2
                               + B * S_pad * dkp * 4),                    # out
        ),
    )(q_proj, k_proj, v_proj)

    # Strip sequence / lane padding.
    return attn_out[:, :S, :d_k]


# --------------------------------------------------------------------------
# Pure-JAX reference (matches the intended PyTorch semantics).
# --------------------------------------------------------------------------
def _reference(E, wq, bq, wk, bk, wv, bv, d_k):
    q = jnp.einsum("bse,de->bsd", E, wq) + bq
    k = jnp.einsum("bse,de->bsd", E, wk) + bk
    v = jnp.einsum("bse,fe->bsf", E, wv) + bv
    s = jnp.einsum("bqd,bkd->bqk", q, k) / math.sqrt(d_k)
    attn = jax.nn.softmax(s, axis=-1)
    return jnp.einsum("bqk,bkd->bqd", attn, v[..., :d_k])


if __name__ == "__main__":
    batch_size, seq_len, emb_dim, d_k = 2, 5, 8, 4

    key = jax.random.PRNGKey(0)
    k_e, k_wq, k_bq, k_wk, k_bk, k_wv, k_bv = jax.random.split(key, 7)

    E = jax.random.normal(k_e, (batch_size, seq_len, emb_dim), dtype=jnp.float32)

    # Deterministic parameter init mimicking nn.Linear default U(-1/sqrt(fan_in), +)
    bound = 1.0 / math.sqrt(emb_dim)
    wq = jax.random.uniform(k_wq, (d_k, emb_dim), minval=-bound, maxval=bound)
    bq = jax.random.uniform(k_bq, (d_k,), minval=-bound, maxval=bound)
    wk = jax.random.uniform(k_wk, (d_k, emb_dim), minval=-bound, maxval=bound)
    bk = jax.random.uniform(k_bk, (d_k,), minval=-bound, maxval=bound)
    wv = jax.random.uniform(k_wv, (emb_dim, emb_dim), minval=-bound, maxval=bound)
    bv = jax.random.uniform(k_bv, (emb_dim,), minval=-bound, maxval=bound)

    out = self_att_head_level1(E, wq, bq, wk, bk, wv, bv, d_k)
    out = jax.block_until_ready(out)

    ref = _reference(E, wq, bq, wk, bk, wv, bv, d_k)
    assert out.shape == (batch_size, seq_len, d_k)
    # bf16 MXU inputs with f32 accumulation -> loosened tolerance vs f32 ref.
    assert jnp.allclose(out, ref, atol=2e-2, rtol=2e-2), "mismatch vs JAX reference"

    print("KERNEL_OK")
</pallas_src>

<mosaic_0001>
module attributes {stable_mosaic.version = 11 : i64} {
  func.func @kernel(%arg0: i32, %arg1: i32, %arg2: memref<1x16x8xf32, #tpu.memory_space<vmem>>, %arg3: memref<8x128xbf16, #tpu.memory_space<vmem>>, %arg4: memref<1x128xf32, #tpu.memory_space<vmem>>, %arg5: memref<8x128xbf16, #tpu.memory_space<vmem>>, %arg6: memref<1x128xf32, #tpu.memory_space<vmem>>, %arg7: memref<8x128xbf16, #tpu.memory_space<vmem>>, %arg8: memref<1x128xf32, #tpu.memory_space<vmem>>, %arg9: memref<1x16x128xbf16, #tpu.memory_space<vmem>>, %arg10: memref<1x16x128xbf16, #tpu.memory_space<vmem>>, %arg11: memref<1x16x128xbf16, #tpu.memory_space<vmem>>) attributes {dimension_semantics = [#tpu.dimension_semantics<parallel>, #tpu.dimension_semantics<parallel>], iteration_bounds = array<i64: 2, 1>, scalar_prefetch = 0 : i64, scratch_operands = 0 : i64, tpu.core_type = #tpu.core_type<tc>, window_params = [{transform_indices = @transform_0, window_bounds = array<i64: 1, 16, 8>}, {pipeline_mode = #tpu.pipeline_mode<synchronous>, transform_indices = @transform_1, window_bounds = array<i64: 8, 128>}, {pipeline_mode = #tpu.pipeline_mode<synchronous>, transform_indices = @transform_2, window_bounds = array<i64: 1, 128>}, {pipeline_mode = #tpu.pipeline_mode<synchronous>, transform_indices = @transform_3, window_bounds = array<i64: 8, 128>}, {pipeline_mode = #tpu.pipeline_mode<synchronous>, transform_indices = @transform_4, window_bounds = array<i64: 1, 128>}, {pipeline_mode = #tpu.pipeline_mode<synchronous>, transform_indices = @transform_5, window_bounds = array<i64: 8, 128>}, {pipeline_mode = #tpu.pipeline_mode<synchronous>, transform_indices = @transform_6, window_bounds = array<i64: 1, 128>}, {transform_indices = @transform_7, window_bounds = array<i64: 1, 16, 128>}, {transform_indices = @transform_8, window_bounds = array<i64: 1, 16, 128>}, {transform_indices = @transform_9, window_bounds = array<i64: 1, 16, 128>}]} {
    %c0 = arith.constant 0 : index
    %c0_0 = arith.constant 0 : index
    %c0_1 = arith.constant 0 : index
    %0 = vector.load %arg2[%c0, %c0_0, %c0_1] : memref<1x16x8xf32, #tpu.memory_space<vmem>>, vector<1x16x8xf32>
    %1 = vector.shape_cast %0 : vector<1x16x8xf32> to vector<16x8xf32>
    %2 = arith.truncf %1 : vector<16x8xf32> to vector<16x8xbf16>
    %c0_2 = arith.constant 0 : index
    %c0_3 = arith.constant 0 : index
    %3 = vector.load %arg3[%c0_2, %c0_3] : memref<8x128xbf16, #tpu.memory_space<vmem>>, vector<8x128xbf16>
    %cst = arith.constant dense<0.000000e+00> : vector<16x128xf32>
    %4 = tpu.matmul %2, %3, %cst {dimension_numbers = #tpu.dot_dimension_numbers<[1], [0], [0], [1], [0, 0, 1, 1], [], []>} : vector<16x8xbf16>, vector<8x128xbf16>, vector<16x128xf32> -> vector<16x128xf32>
    %c0_4 = arith.constant 0 : index
    %c0_5 = arith.constant 0 : index
    %5 = vector.load %arg4[%c0_4, %c0_5] : memref<1x128xf32, #tpu.memory_space<vmem>>, vector<1x128xf32>
    %6 = vector.broadcast %5 : vector<1x128xf32> to vector<16x128xf32>
    %7 = arith.addf %4, %6 : vector<16x128xf32>
    %cst_6 = arith.constant 5.000000e-01 : f32
    %8 = vector.broadcast %cst_6 : f32 to vector<16x128xf32>
    %9 = arith.mulf %7, %8 : vector<16x128xf32>
    %10 = arith.truncf %9 : vector<16x128xf32> to vector<16x128xbf16>
    %c0_7 = arith.constant 0 : index
    %c0_8 = arith.constant 0 : index
    %c0_9 = arith.constant 0 : index
    %11 = vector.load %arg9[%c0_7, %c0_8, %c0_9] : memref<1x16x128xbf16, #tpu.memory_space<vmem>>, vector<1x16x128xbf16>
    %12 = vector.shape_cast %11 : vector<1x16x128xbf16> to vector<16x128xbf16>
    %13 = vector.shape_cast %10 : vector<16x128xbf16> to vector<1x16x128xbf16>
    tpu.vector_store %arg9[%c0_7, %c0_8, %c0_9], %13 {strides = array<i32>} : memref<1x16x128xbf16, #tpu.memory_space<vmem>>, vector<1x16x128xbf16>,
    %c0_10 = arith.constant 0 : index
    %c0_11 = arith.constant 0 : index
    %14 = vector.load %arg5[%c0_10, %c0_11] : memref<8x128xbf16, #tpu.memory_space<vmem>>, vector<8x128xbf16>
    %cst_12 = arith.constant dense<0.000000e+00> : vector<16x128xf32>
    %15 = tpu.matmul %2, %14, %cst_12 {dimension_numbers = #tpu.dot_dimension_numbers<[1], [0], [0], [1], [0, 0, 1, 1], [], []>} : vector<16x8xbf16>, vector<8x128xbf16>, vector<16x128xf32> -> vector<16x128xf32>
    %c0_13 = arith.constant 0 : index
    %c0_14 = arith.constant 0 : index
    %16 = vector.load %arg6[%c0_13, %c0_14] : memref<1x128xf32, #tpu.memory_space<vmem>>, vector<1x128xf32>
    %17 = vector.broadcast %16 : vector<1x128xf32> to vector<16x128xf32>
    %18 = arith.addf %15, %17 : vector<16x128xf32>
    %19 = arith.truncf %18 : vector<16x128xf32> to vector<16x128xbf16>
    %c0_15 = arith.constant 0 : index
    %c0_16 = arith.constant 0 : index
    %c0_17 = arith.constant 0 : index
    %20 = vector.load %arg10[%c0_15, %c0_16, %c0_17] : memref<1x16x128xbf16, #tpu.memory_space<vmem>>, vector<1x16x128xbf16>
    %21 = vector.shape_cast %20 : vector<1x16x128xbf16> to vector<16x128xbf16>
    %22 = vector.shape_cast %19 : vector<16x128xbf16> to vector<1x16x128xbf16>
    tpu.vector_store %arg10[%c0_15, %c0_16, %c0_17], %22 {strides = array<i32>} : memref<1x16x128xbf16, #tpu.memory_space<vmem>>, vector<1x16x128xbf16>,
    %c0_18 = arith.constant 0 : index
    %c0_19 = arith.constant 0 : index
    %23 = vector.load %arg7[%c0_18, %c0_19] : memref<8x128xbf16, #tpu.memory_space<vmem>>, vector<8x128xbf16>
    %cst_20 = arith.constant dense<0.000000e+00> : vector<16x128xf32>
    %24 = tpu.matmul %2, %23, %cst_20 {dimension_numbers = #tpu.dot_dimension_numbers<[1], [0], [0], [1], [0, 0, 1, 1], [], []>} : vector<16x8xbf16>, vector<8x128xbf16>, vector<16x128xf32> -> vector<16x128xf32>
    %c0_21 = arith.constant 0 : index
    %c0_22 = arith.constant 0 : index
    %25 = vector.load %arg8[%c0_21, %c0_22] : memref<1x128xf32, #tpu.memory_space<vmem>>, vector<1x128xf32>
    %26 = vector.broadcast %25 : vector<1x128xf32> to vector<16x128xf32>
    %27 = arith.addf %24, %26 : vector<16x128xf32>
    %28 = arith.truncf %27 : vector<16x128xf32> to vector<16x128xbf16>
    %c0_23 = arith.constant 0 : index
    %c0_24 = arith.constant 0 : index
    %c0_25 = arith.constant 0 : index
    %29 = vector.load %arg11[%c0_23, %c0_24, %c0_25] : memref<1x16x128xbf16, #tpu.memory_space<vmem>>, vector<1x16x128xbf16>
    %30 = vector.shape_cast %29 : vector<1x16x128xbf16> to vector<16x128xbf16>
    %31 = vector.shape_cast %28 : vector<16x128xbf16> to vector<1x16x128xbf16>
    tpu.vector_store %arg11[%c0_23, %c0_24, %c0_25], %31 {strides = array<i32>} : memref<1x16x128xbf16, #tpu.memory_space<vmem>>, vector<1x16x128xbf16>,
    return
  }
  func.func @transform_0(%arg0: i32, %arg1: i32) -> (i32, i32, i32) {
    %c0_i32 = arith.constant 0 : i32
    %c0_i32_0 = arith.constant 0 : i32
    return %arg0, %arg1, %c0_i32 : i32, i32, i32
  }
  func.func @transform_1(%arg0: i32, %arg1: i32) -> (i32, i32) {
    %c0_i32 = arith.constant 0 : i32
    %c0_i32_0 = arith.constant 0 : i32
    %c0_i32_1 = arith.constant 0 : i32
    return %c0_i32, %c0_i32_0 : i32, i32
  }
  func.func @transform_2(%arg0: i32, %arg1: i32) -> (i32, i32) {
    %c0_i32 = arith.constant 0 : i32
    %c0_i32_0 = arith.constant 0 : i32
    %c0_i32_1 = arith.constant 0 : i32
    return %c0_i32, %c0_i32_0 : i32, i32
  }
  func.func @transform_3(%arg0: i32, %arg1: i32) -> (i32, i32) {
    %c0_i32 = arith.constant 0 : i32
    %c0_i32_0 = arith.constant 0 : i32
    %c0_i32_1 = arith.constant 0 : i32
    return %c0_i32, %c0_i32_0 : i32, i32
  }
  func.func @transform_4(%arg0: i32, %arg1: i32) -> (i32, i32) {
    %c0_i32 = arith.constant 0 : i32
    %c0_i32_0 = arith.constant 0 : i32
    %c0_i32_1 = arith.constant 0 : i32
    return %c0_i32, %c0_i32_0 : i32, i32
  }
  func.func @transform_5(%arg0: i32, %arg1: i32) -> (i32, i32) {
    %c0_i32 = arith.constant 0 : i32
    %c0_i32_0 = arith.constant 0 : i32
    %c0_i32_1 = arith.constant 0 : i32
    return %c0_i32, %c0_i32_0 : i32, i32
  }
  func.func @transform_6(%arg0: i32, %arg1: i32) -> (i32, i32) {
    %c0_i32 = arith.constant 0 : i32
    %c0_i32_0 = arith.constant 0 : i32
    %c0_i32_1 = arith.constant 0 : i32
    return %c0_i32, %c0_i32_0 : i32, i32
  }
  func.func @transform_7(%arg0: i32, %arg1: i32) -> (i32, i32, i32) {
    %c0_i32 = arith.constant 0 : i32
    %c0_i32_0 = arith.constant 0 : i32
    return %arg0, %arg1, %c0_i32 : i32, i32, i32
  }
  func.func @transform_8(%arg0: i32, %arg1: i32) -> (i32, i32, i32) {
    %c0_i32 = arith.constant 0 : i32
    %c0_i32_0 = arith.constant 0 : i32
    return %arg0, %arg1, %c0_i32 : i32, i32, i32
  }
  func.func @transform_9(%arg0: i32, %arg1: i32) -> (i32, i32, i32) {
    %c0_i32 = arith.constant 0 : i32
    %c0_i32_0 = arith.constant 0 : i32
    return %arg0, %arg1, %c0_i32 : i32, i32, i32
  }
}

</mosaic_0001>

<bundles_post_ra>
// kernel: tpu_custom_call.1
= control target key start
LH: loop header
LB: loop body
LE: loop exit
PB: predicated region body
PF: predicated region fallthrough
CT: control target
= control target key end

     0   :  { %s1203_s0 = inlined_call_operand.vmem [shape: f32[2,16,8], index: 0, kind: input, shape index: {}]   ;;  %s1204_s1 = inlined_call_operand.vmem [shape: bf16[8,128], index: 1, kind: input, shape index: {}]   ;;  %s1205_s2 = inlined_call_operand.vmem [shape: f32[1,128], index: 2, kind: input, shape index: {}]   ;;  %s1206_s3 = inlined_call_operand.vmem [shape: bf16[8,128], index: 3, kind: input, shape index: {}]   ;;  %s1207_s4 = inlined_call_operand.vmem [shape: f32[1,128], index: 4, kind: input, shape index: {}]   ;;  %s1208_s5 = inlined_call_operand.vmem [shape: bf16[8,128], index: 5, kind: input, shape index: {}]   ;;  %s1209_s6 = inlined_call_operand.vmem [shape: f32[1,128], index: 6, kind: input, shape index: {}]   ;;  %s1210_s7 = inlined_call_operand.hbm [shape: bf16[2,16,128], index: 7, kind: output, shape index: {0}]   ;;  %s1211_s8 = inlined_call_operand.hbm [shape: bf16[2,16,128], index: 8, kind: output, shape index: {1}]   ;;  %s1212_s9 = inlined_call_operand.hbm [shape: bf16[2,16,128], index: 9, kind: output, shape index: {2}]  }
   0x1   :  { %1219 = sst [smem:[#allocation11_spill]] %s1203_s0 }
   0x2   :  { %1220 = sst [smem:[#allocation12_spill]] %s1204_s1 }
   0x3   :  { %1221 = sst [smem:[#allocation13_spill]] %s1205_s2 }
   0x4   :  { %1222 = sst [smem:[#allocation14_spill]] %s1206_s3 }
   0x5   :  { %1223 = sst [smem:[#allocation15_spill]] %s1207_s4 }
   0x6   :  { %1224 = sst [smem:[#allocation16_spill]] %s1208_s5 }
   0x7   :  { %15 = vsyncpa [#allocation3], 0 }
   0x8   :  { %17 = vsyncpa [#allocation3 + $0x1], 0 }
   0x9   :  { %18 = vsyncpa [#allocation5], 0 }
   0xa   :  { %20 = vsyncpa [#allocation5 + $0x1], 0  ;;  %s994_s30 = smov 0   ;;  %s996_s10 = smov 0  }
   0xb   :  { %s998_s11 = smov 0   ;;  %s1000_s12 = smov 0  }
   0xc   :  { %s1002_s13 = smov 0   ;;  %s1004_s14 = smov 0  }
   0xd LB: > { %s1215_s15 = sadd.s32 4294967295, %s940_s14   ;;  %s1213_s16 = sadd.s32 4294967294, %s940_s14   ;;  %s940_s14 = sphi %s1004_s14, %s26_s14   ;;  %s936_s13 = sphi %s1002_s13, %s1247_s13   ;;  %s932_s12 = sphi %s1000_s12, %s1246_s12   ;;  %s928_s11 = sphi %s998_s11, %s1245_s11   ;;  %s924_s10 = sphi %s996_s10, %s1244_s10   ;;  %s920_s30 = sphi %s994_s30, %s1243_s30  }
   0xe   : > { %s38_s17 = sadd.s32 1, %s936_s13  ;;  %s201_s18 = sadd.s32 1, %s928_s11 }
   0xf   : > { %p40_p0 = scmp.ge.s32.totalorder %s38_s17, 2  ;;  %p211_p1 = scmp.ne.s32.totalorder %s928_s11, %s924_s10 }
  0x10   : > { %p212_p2 = scmp.eq.s32.totalorder %s1215_s15, 1  ;;  %p217_p3 = scmp.ne.s32.totalorder %s924_s10, %s920_s30 }
  0x11   : > { %s1249_s17 = smov (%p40_p0, %s38_s17), 0  ;;  %p218_p5 = scmp.eq.s32.totalorder %s1213_s16, 1 }
  0x12   : > { %p1036_p4 = por %p212_p2, %p211_p1  ;;  %s196_s20 = ssub.s32 %s936_s13, %s1249_s17 }
  0x13   : > { %p693_p6 = scmp.ge.s32.totalorder %s940_s14, 1  ;;  %p199_p7 = scmp.eq.s32.totalorder %s196_s20, 0 }
  0x14   : > { %p1045_p8 = por %p218_p5, %p217_p3  ;;  %p323_p9 = scmp.lt.s32.totalorder %s940_s14, 3 }
  0x15   : > { %s1051_s22 = scalar_select %p199_p7, %s928_s11, %s201_s18  }
  0x16   : > { %p324_p10 = pnand %p693_p6, %p323_p9 }
  0x18   : > { %327 = sbr.rel (%p324_p10) target bundleno = 211 (0xd3), region = 48 }
  0x1d   : > { %s1227_s1 = sld [smem:[#allocation12_spill]]  ;;  %vm399_vm0 = vcmask 1043456   ;;  %p374_p11 = scmp.lt.s32.totalorder %s932_s12, 1  ;;  %vm395_vm1 = vcmask 64512   ;;  %v801_v23 = vld [vmem:[%s1209_s6] ss:$0 sm:$0xff] }
  0x1e   : > { %s1228_s3 = sld [smem:[#allocation14_spill]]  ;;  %s1214_s25 = sand.u32 1, %s924_s10  }
  0x1f   : > { %s1229_s5 = sld [smem:[#allocation16_spill]]  ;;  %s1070_s26 = sshll.u32 %s1214_s25, 3 }
  0x20   : > { %s375_s29 = scalar_select %p374_p11, %s932_s12, 1 }
  0x21   : > { %s1230_s0 = sld [smem:[#allocation11_spill]]  ;;  %s1073_s27 = sshll.u32 %s932_s12, 3 }
  0x22   : > { %s713_s18 = sshll.u32 %s375_s29, 4  ;;  %s1231_s2 = sld [smem:[#allocation13_spill]] }
  0x23   : > { %v390_v0 = vld [vmem:[%s1227_s1] sm:$0xf]  ;;  %s1232_s4 = sld [smem:[#allocation15_spill]]  ;;  %s1216_s23 = scalar_lea.vmem [#allocation2], %s1070_s26 }
  0x24   : > { %v423_v1 = vld [vmem:[%s1228_s3] sm:$0xf]  ;;  %v401_v2 = vsel %vm399_vm0, %v390_v0, 0  ;;  %s518_s12 = scalar_lea.hbm %s1211_s8, %s1073_s27  ;;  %s365_s15 = scalar_lea.vmem [#allocation4], %s1070_s26 }
  0x25   : > { %v429_v3 = vsel %vm399_vm0, %v423_v1, 0  ;;  %v449_v4 = vld [vmem:[%s1229_s5] sm:$0xf]  ;;  %410 = vmatpush.bf16.msra.mxu0 %v401_v2  ;;  %s1235_s28 = sadd.s32 4294967295, %s940_s14   ;;  %s1102_s16 = sshll.u32 %s518_s12, 4  ;;  %s522_s16 = int_to_ptr.hbm [resolvable:$true] %s1102_s16 }
  0x26   : > { %438 = vmatpush.bf16.msra.mxu1 %v429_v3  ;;  %v455_v5 = vsel %vm399_vm0, %v449_v4, 0  ;;  %s1095_s29 = sand.u32 1, %s1235_s28   ;;  %s816_s1 = sshra.s32 %s522_s16, 4  ;;  %s817_s1 = int_to_ptr.hbm [resolvable:$true] %s816_s1 }
  0x27   : > { %464 = vmatpush.bf16.msra.mxu2 %v455_v5  ;;  %s381_s24 = scalar_lea.vmem %s1230_s0, %s713_s18  ;;  %s1091_s0 = sshll.u32 %s365_s15, 4 }
  0x28   : > { %v387_v6 = vld [vmem:[%s381_s24] sm:$0xff]  ;;  %v388_v7 = vld [vmem:[%s381_s24 + $0x8] sm:$0xff]  ;;  %s1084_s24 = sshll.u32 %s1216_s23, 4  ;;  %1234 = sst [smem:[#allocation10_spill]] %s1091_s0 }
  0x29   : > { %v389_v8 = vpack.c.bf16 %v388_v7, %v387_v6  ;;  %v799_v11 = vld [vmem:[%s1231_s2] ss:$0 sm:$0xff]  ;;  %1233 = sst [smem:[#allocation9_spill]] %s1084_s24  ;;  %s499_s23 = scalar_lea.hbm %s1210_s7, %s1073_s27 }
  0x2a   : > { %v800_v12 = vld [vmem:[%s1232_s4] ss:$0 sm:$0xff]  ;;  %s1105_s25 = sshll.u32 %s499_s23, 4  ;;  %s537_s24 = scalar_lea.hbm %s1212_s9, %s1073_s27  ;;  %s503_s25 = int_to_ptr.hbm [resolvable:$true] %s1105_s25 }
  0x2b   : > { %699 = vmatmul.msk.bf16.vlgmr.msra.gmra.mxu0 %vm395_vm1, %v389_v8  ;;  %700 = vmatmul.msk.bf16.vlgmr.msra.gmra.mxu1 %vm395_vm1, %v389_v8  ;;  %s481_s0 = scalar_lea.sflag [#allocation5], %s1095_s29  ;;  %s818_s23 = scalar_lea.hbm %s817_s1, 8 }
  0x2c   : > { %701 = vmatmul.msk.bf16.vlgmr.msra.gmra.mxu2 %vm395_vm1, %v389_v8  ;;  %p819_p12 = scmp.ne.s32.totalorder %s817_s1, %s818_s23  ;;  %s822_s28 = scalar_lea.hbm %s1211_s8, 16 }
  0x2d   : > { %p823_p1 = scmp.lt.s32.totalorder %s817_s1, %s1211_s8  ;;  %p824_p2 = scmp.lt.s32.totalorder %s822_s28, %s818_s23 }
  0x2e   : > { %p820_p13 = pnand %p819_p12, %p1036_p4 }
  0x2f   : > { %p825_p3 = por %p824_p2, %p823_p1 }
  0x30   : > { %p821_p0 = pneg %p820_p13 }
  0x32   : > { %p826_p5 = pnand %p825_p3, %p821_p0 }
  0xa8   : > { %v412_v9 = vpop.f32.mrf.mxu0  ;;  %v440_v10 = vpop.f32.mrf.mxu1 }
  0xa9   : > { %v413_v13 = vadd.f32 %v799_v11, %v412_v9  ;;  %v441_v17 = vadd.f32 %v800_v12, %v440_v10 }
  0xab   : > { %v417_v20 = vmul.f32 0.5, %v413_v13 }
  0xaf   : > { %v466_v14 = vpop.f32.mrf.mxu2 }
  0xb0   : > { %v414_v15 = vpop.f32.mrf.mxu0  ;;  %v442_v16 = vpop.f32.mrf.mxu1 }
  0xb1   : > { %v415_v18 = vadd.f32 %v799_v11, %v414_v15  ;;  %v443_v19 = vadd.f32 %v800_v12, %v442_v16 }
  0xb3   : > { %v418_v21 = vmul.f32 0.5, %v415_v18  ;;  %v725_v22 = vpack.c.bf16 %v443_v19, %v441_v17 }
  0xb5   : > { %v720_v24 = vpack.c.bf16 %v418_v21, %v417_v20  ;;  %726 = vst [vmem:[%s365_s15] sm:$0xff] %v725_v22  }
  0xb6   : > { %829 = shalt.err (!%p826_p5)
}
  0xb7   : > { %s942_s15 = smov 64   ;;  %s1236_s27 = sld [smem:[#allocation10_spill]]  ;;  %v468_v25 = vpop.f32.mrf.mxu2  ;;  %v467_v26 = vadd.f32 %v801_v23, %v466_v14 }
  0xb8   : > { %s943_s20 = smov 4   ;;  %s1238_s2 = scalar_lea.vmem [#allocation2], %s1070_s26  ;;  %v469_v27 = vadd.f32 %v801_v23, %v468_v25 }
  0xb9   : > { %721 = vst [vmem:[%s1238_s2] sm:$0xff] %v720_v24   ;;  %s372_s3 = scalar_lea.vmem [#allocation6], %s1070_s26  ;;  %s1139_s12 = sshll.u32 %s537_s24, 4  ;;  %s541_s12 = int_to_ptr.hbm [resolvable:$true] %s1139_s12 }
  0xba   : > { %s1137_s4 = sshll.u32 %s372_s3, 4  ;;  %s1239_s23 = sand.u32 1, %s924_s10   ;;  %s539_s4 = int_to_ptr.vmem [resolvable:$true] %s1137_s4 }
  0xbb   : > { %s476_s28 = scalar_lea.sflag [#allocation3], %s1239_s23  ;;  %s844_s18 = sshra.s32 %s503_s25, 4  ;;  %s845_s18 = int_to_ptr.hbm [resolvable:$true] %s844_s18 }
  0xbc   : > { %s846_s5 = scalar_lea.hbm %s845_s18, 8  ;;  %s850_s26 = scalar_lea.hbm %s1210_s7, 16 }
  0xbd   : > { %s1237_s1 = int_to_ptr.vmem [resolvable:$true] %s1236_s27  ;;  %p847_p6 = scmp.ne.s32.totalorder %s845_s18, %s846_s5 }
  0xbe   : > { %733 = dma.vmem_to_hbm [thread:$0]  (%p1036_p4), %s1237_s1, 128, %s522_s16, %s481_s0, %s942_s15, %s942_s15, %s943_s20  }
  0xbf   : > { %p848_p7 = pnand %p847_p6, %p1036_p4  ;;  %p851_p10 = scmp.lt.s32.totalorder %s845_s18, %s1210_s7 }
  0xc0   : > { %p852_p11 = scmp.lt.s32.totalorder %s850_s26, %s846_s5 }
  0xc1   : > { %p849_p9 = pneg %p848_p7 }
  0xc2   : > { %p853_p12 = por %p852_p11, %p851_p10 }
  0xc4   : > { %p854_p13 = pnand %p853_p12, %p849_p9 }
  0xc6   : > { %857 = shalt.err (!%p854_p13)
}
  0xc7   : > { %s1240_s24 = sld [smem:[#allocation9_spill]]  ;;  %v730_v28 = vpack.c.bf16 %v469_v27, %v467_v26  ;;  %s872_s5 = sshra.s32 %s541_s12, 4  ;;  %s873_s5 = int_to_ptr.hbm [resolvable:$true] %s872_s5 }
  0xc8   : > { %s874_s18 = scalar_lea.hbm %s873_s5, 8  ;;  %s878_s26 = scalar_lea.hbm %s1212_s9, 16 }
  0xc9   : > { %731 = vst [vmem:[%s372_s3] sm:$0xff] %v730_v28   ;;  %p875_p0 = scmp.ne.s32.totalorder %s873_s5, %s874_s18  ;;  %p879_p3 = scmp.lt.s32.totalorder %s873_s5, %s1212_s9 }
  0xca   : > { %p880_p5 = scmp.lt.s32.totalorder %s878_s26, %s874_s18 }
  0xcb   : > { %p876_p1 = pnand %p875_p0, %p1036_p4 }
  0xcc   : > { %p881_p6 = por %p880_p5, %p879_p3 }
  0xcd   : > { %s1241_s23 = int_to_ptr.vmem [resolvable:$true] %s1240_s24  ;;  %p877_p2 = pneg %p876_p1 }
  0xce   : > { %732 = dma.vmem_to_hbm [thread:$0]  (%p1036_p4), %s1241_s23, 128, %s503_s25, %s476_s28, %s942_s15, %s942_s15, %s943_s20  }
  0xcf   : > { %p882_p7 = pnand %p881_p6, %p877_p2 }
  0xd1   : > { %885 = shalt.err (!%p882_p7)
}
  0xd2   : > { %734 = dma.vmem_to_hbm [thread:$0]  (%p1036_p4), %s539_s4, 128, %s541_s12, %s481_s0, %s942_s15, %s942_s15, %s943_s20  }
  0xd3 PF: > { %p748_p9 = scmp.ge.s32.totalorder %s940_s14, 2  ;;  %s555_s25 = sand.u32 1, %s920_s30  }
  0xd4   : > { %s556_s3 = scalar_lea.sflag [#allocation3], %s555_s25 }
  0xd5   : > { %p739_p10 = pnand %p748_p9, %p1045_p8 }
  0xd7   : > { %p740_p11 = pneg %p739_p10 }
  0xd9   : > { %911 = dma.done.wait (%p740_p11), %s556_s3, 128  }
  0xda   : > { %913 = vsyncadd (%p740_p11), %s556_s3, 4294967168  ;;  %s1242_s19 = sadd.s32 4294967294, %s940_s14  }
  0xdb   : > { %s565_s28 = sand.u32 1, %s1242_s19  }
  0xdc   : > { %s566_s24 = scalar_lea.sflag [#allocation5], %s565_s28 }
  0xdd   : > { %915 = dma.done.wait (%p740_p11), %s566_s24, 256  }
  0xde   : > { %917 = vsyncadd (%p740_p11), %s566_s24, 4294967040  ;;  %s26_s14 = sadd.s32 1, %s940_s14   ;;  %s1243_s30 = smov %s924_s10 }
  0xdf   : > { %p23_p4 = scmp.ge.s32.totalorder %s26_s14, 4   ;;  %s1244_s10 = smov %s928_s11 }
  0xe0   : > { %s1245_s11 = smov %s1051_s22  ;;  %s1246_s12 = smov %s936_s13 }
  0xe1   : > { %s1247_s13 = smov %s1249_s17  ;;  %25 = sbr.rel (!%p23_p4) target bundleno = 13 (0xd), region = 115 }
  0xe6   :  { %582 = vsyncpa [#allocation3], 1 }
  0xe7   :  { %584 = vsyncpa [#allocation3 + $0x1], 1 }
  0xe8   :  { %585 = vsyncpa [#allocation5], 1 }
  0xe9   :  { %587 = vsyncpa [#allocation5 + $0x1], 1 }

</bundles_post_ra>
